<compile_context>
chip_gen: v6e
topology: v6e:2x2x1
jax: 0.10.0
libtpu: 0.0.40
codegen_flags: <defaults>
</compile_context>

<pallas_src>
import jax
import jax.numpy as jnp
from jax.experimental import pallas as pl
from jax.experimental.pallas import tpu as pltpu


def _threshold_kernel(tv_ref, x_ref, o_ref):
    """tv_ref: SMEM (2,) float32 holding [threshold, value]."""
    x = x_ref[...]
    # Match torch semantics: the scalar is cast to the input dtype, then compared.
    thr = tv_ref[0].astype(x.dtype)
    val = tv_ref[1].astype(x.dtype)
    o_ref[...] = jnp.where(x > thr, x, val)


def _choose_2d_shape(n, rmult):
    """Lane-dense (rows, width) factorization of n with width % 128 == 0.

    Prefers widths whose row count is a multiple of `rmult` (sublane packing
    granularity: 8 for 32-bit, 16 for bf16, 32 for int8/fp8) so tiles fill
    packed vregs and stores stay unmasked. Returns None if 128 does not
    divide n.
    """
    widths = (8192, 4096, 2048, 1024, 512, 256, 128)
    for w in widths:
        if n % w == 0 and (n // w) % rmult == 0:
            return n // w, w
    for w in widths:
        if n % w == 0:
            return n // w, w
    return None


_TILE_BYTES = 4 * 1024 * 1024         # per-tile budget; x4 buffers = 16 MiB
_VMEM_LIMIT = 32 * 1024 * 1024        # safe on v5e/v6e (128 MiB) and v7x (64 MiB)
_MIN_BLOCKS_BYTES = 8 * 1024 * 1024   # above this, force >= 4 blocks (megacore / overlap)


def _run_lane_dense(x2d, tv):
    rows, width = x2d.shape
    itemsize = jnp.dtype(x2d.dtype).itemsize
    rmult = 8 * max(1, 4 // itemsize)
    total_bytes = rows * width * itemsize

    budget_rows = max(rmult, (_TILE_BYTES // (width * itemsize)) // rmult * rmult)
    if total_bytes > _MIN_BLOCKS_BYTES:
        # Keep >= 4 blocks in flight: lets v7x shard the parallel axis across
        # its two TensorCores and overlaps writeback with prefetch.
        cap = max(rmult, (rows // 4) // rmult * rmult)
        budget_rows = min(budget_rows, cap)
    block_rows = rows if budget_rows >= rows else budget_rows

    grid = (pl.cdiv(rows, block_rows),)  # partial edge block is masked by Pallas
    return pl.pallas_call(
        _threshold_kernel,
        out_shape=jax.ShapeDtypeStruct((rows, width), x2d.dtype),
        grid_spec=pltpu.PrefetchScalarGridSpec(
            num_scalar_prefetch=0,
            grid=grid,
            in_specs=[
                pl.BlockSpec(memory_space=pltpu.MemorySpace.SMEM),   # [thr, val]
                pl.BlockSpec((block_rows, width), lambda i: (i, 0)),
            ],
            out_specs=pl.BlockSpec((block_rows, width), lambda i: (i, 0)),
        ),
        compiler_params=pltpu.CompilerParams(
            dimension_semantics=("parallel",),
            vmem_limit_bytes=_VMEM_LIMIT,
        ),
        cost_estimate=pl.CostEstimate(
            flops=rows * width,
            transcendentals=0,
            bytes_accessed=2 * rows * width * itemsize,
        ),
    )(tv, x2d)


def _run_single_block(x2d, tv):
    """Whole (small) array as one full-extent block — legal for any shape."""
    rows, width = x2d.shape
    itemsize = jnp.dtype(x2d.dtype).itemsize
    return pl.pallas_call(
        _threshold_kernel,
        out_shape=jax.ShapeDtypeStruct((rows, width), x2d.dtype),
        grid_spec=pltpu.PrefetchScalarGridSpec(
            num_scalar_prefetch=0,
            grid=(1,),
            in_specs=[
                pl.BlockSpec(memory_space=pltpu.MemorySpace.SMEM),
                pl.BlockSpec((rows, width), lambda i: (0, 0)),
            ],
            out_specs=pl.BlockSpec((rows, width), lambda i: (0, 0)),
        ),
        compiler_params=pltpu.CompilerParams(
            vmem_limit_bytes=_VMEM_LIMIT,
        ),
        cost_estimate=pl.CostEstimate(
            flops=rows * width,
            transcendentals=0,
            bytes_accessed=2 * rows * width * itemsize,
        ),
    )(tv, x2d)


@jax.jit
def threshold(x, threshold, value):
    """Elementwise threshold, matching torch.nn.functional.threshold.

    threshold/value are runtime scalars: changing them does not recompile.
    """
    orig_shape = x.shape
    n = x.size
    itemsize = jnp.dtype(x.dtype).itemsize
    rmult = 8 * max(1, 4 // itemsize)
    tv = jnp.stack([jnp.asarray(threshold, jnp.float32),
                    jnp.asarray(value, jnp.float32)])
    flat = x.reshape(-1)

    if n % 128 == 0:
        rows, width = _choose_2d_shape(n, rmult)
        out2d = _run_lane_dense(flat.reshape(rows, width), tv)
        return out2d.reshape(orig_shape)

    if n * itemsize <= 512 * 1024:
        # Small, non-128-multiple: one full-extent (1, n) block. No pad, no copy.
        out2d = _run_single_block(flat.reshape(1, n), tv)
        return out2d.reshape(orig_shape)

    # Large and non-128-multiple (rare): kernel over the 128-aligned bulk,
    # plain jnp.where over the < 128-element tail.
    bulk = (n // 128) * 128
    rows, width = _choose_2d_shape(bulk, rmult)
    out_bulk = _run_lane_dense(flat[:bulk].reshape(rows, width), tv).reshape(-1)
    tail = flat[bulk:]
    thr = tv[0].astype(x.dtype)
    val = tv[1].astype(x.dtype)
    out_tail = jnp.where(tail > thr, tail, val)
    return jnp.concatenate([out_bulk, out_tail]).reshape(orig_shape)


def _reference_threshold(x, thr, val):
    t = jnp.asarray(thr, jnp.float32).astype(x.dtype)
    v = jnp.asarray(val, jnp.float32).astype(x.dtype)
    return jnp.where(x > t, x, v)


if __name__ == "__main__":
    key = jax.random.PRNGKey(0)
    thr, val = 0.1, 20.0

    # NCHW-style conv-feature input, like m = nn.Threshold(0.1, 20); m(x).
    x = jax.random.normal(key, (2, 4, 16, 16), dtype=jnp.float32)
    out = jax.block_until_ready(threshold(x, thr, val))
    ref = _reference_threshold(x, thr, val)
    assert out.shape == x.shape and out.dtype == x.dtype
    assert jnp.array_equal(out, ref)

    # Docstring example: input = torch.randn(2).  Exercises the small
    # non-128-divisible path (single full-extent (1, n) block, no padding).
    x2 = jax.random.normal(jax.random.PRNGKey(1), (2,), dtype=jnp.float32)
    out2 = jax.block_until_ready(threshold(x2, thr, val))
    ref2 = _reference_threshold(x2, thr, val)
    assert out2.shape == x2.shape and jnp.array_equal(out2, ref2)

    # bf16 input: exercises the dtype-aware (rows % 16 == 0) factorization.
    x3 = jax.random.normal(jax.random.PRNGKey(2), (4, 8, 64), dtype=jnp.bfloat16)
    out3 = jax.block_until_ready(threshold(x3, thr, val))
    ref3 = _reference_threshold(x3, thr, val)
    assert out3.shape == x3.shape and out3.dtype == x3.dtype
    assert jnp.array_equal(out3, ref3)

    # Different (threshold, value) on the same shape: must reuse the same
    # compilation (runtime SMEM scalars), and still be correct.
    out4 = jax.block_until_ready(threshold(x, -0.5, 3.0))
    assert jnp.array_equal(out4, _reference_threshold(x, -0.5, 3.0))

    print("KERNEL_OK")
</pallas_src>

<mosaic_0001>
module attributes {stable_mosaic.version = 11 : i64} {
  func.func @_threshold_kernel(%arg0: i32, %arg1: memref<2xf32, #tpu.memory_space<smem>>, %arg2: memref<8x256xf32, #tpu.memory_space<vmem>>, %arg3: memref<8x256xf32, #tpu.memory_space<vmem>>) attributes {dimension_semantics = [#tpu.dimension_semantics<parallel>], iteration_bounds = array<i64: 1>, scalar_prefetch = 0 : i64, scratch_operands = 0 : i64, tpu.core_type = #tpu.core_type<tc>, window_params = [{transform_indices = @transform_0, window_bounds = array<i64: 2>}, {transform_indices = @transform_1, window_bounds = array<i64: 8, 256>}, {transform_indices = @transform_2, window_bounds = array<i64: 8, 256>}]} {
    %c0 = arith.constant 0 : index
    %c0_0 = arith.constant 0 : index
    %0 = vector.load %arg2[%c0, %c0_0] : memref<8x256xf32, #tpu.memory_space<vmem>>, vector<8x256xf32>
    %c0_1 = arith.constant 0 : index
    %1 = memref.load %arg1[%c0_1] : memref<2xf32, #tpu.memory_space<smem>>
    %c1 = arith.constant 1 : index
    %2 = memref.load %arg1[%c1] : memref<2xf32, #tpu.memory_space<smem>>
    %3 = vector.broadcast %1 : f32 to vector<8x256xf32>
    %4 = arith.cmpf ogt, %0, %3 : vector<8x256xf32>
    %5 = vector.broadcast %2 : f32 to vector<8x256xf32>
    %6 = arith.select %4, %0, %5 : vector<8x256xi1>, vector<8x256xf32>
    %c0_2 = arith.constant 0 : index
    %c0_3 = arith.constant 0 : index
    %7 = vector.load %arg3[%c0_2, %c0_3] : memref<8x256xf32, #tpu.memory_space<vmem>>, vector<8x256xf32>
    tpu.vector_store %arg3[%c0_2, %c0_3], %6 {strides = array<i32>} : memref<8x256xf32, #tpu.memory_space<vmem>>, vector<8x256xf32>,
    return
  }
  func.func @transform_0(%arg0: i32) -> i32 {
    %c0_i32 = arith.constant 0 : i32
    %c0_i32_0 = arith.constant 0 : i32
    return %c0_i32 : i32
  }
  func.func @transform_1(%arg0: i32) -> (i32, i32) {
    %c0_i32 = arith.constant 0 : i32
    %c0_i32_0 = arith.constant 0 : i32
    return %arg0, %c0_i32 : i32, i32
  }
  func.func @transform_2(%arg0: i32) -> (i32, i32) {
    %c0_i32 = arith.constant 0 : i32
    %c0_i32_0 = arith.constant 0 : i32
    return %arg0, %c0_i32 : i32, i32
  }
}

</mosaic_0001>

<bundles_post_ra>
// kernel: threshold.2
= control target key start
LH: loop header
LB: loop body
LE: loop exit
PB: predicated region body
PF: predicated region fallthrough
CT: control target
= control target key end

     0   :  { %7 = vsyncpa [#allocation3], 0  ;;  %s88_s0 = inlined_call_operand.vmem [shape: f32[2], index: 0, kind: input, shape index: {}]   ;;  %s89_s1 = inlined_call_operand.vmem [shape: f32[8,256], index: 1, kind: input, shape index: {}]   ;;  %s90_s2 = inlined_call_operand.vmem [shape: f32[8,256], index: 2, kind: output, shape index: {}]  }
   0x1   :  { %s14_s11 = sshll.u32 %s88_s0, 4  ;;  %s15_s11 = int_to_ptr.vmem [resolvable:$true] %s14_s11 }
   0x2   :  { %s43_s12 = scalar_lea.vmem %s15_s11, 16  ;;  %p48_p1 = scmp.lt.s32.totalorder %s15_s11, %s15_s11 }
   0x3   :  { %p44_p0 = scmp.ne.s32.totalorder %s15_s11, %s43_s12  ;;  %p49_p2 = scmp.lt.s32.totalorder %s43_s12, %s43_s12 }
   0x5   :  { %p50_p3 = por %p49_p2, %p48_p1 }
   0x7   :  { %p51_p4 = pnand %p50_p3, %p44_p0 }
   0x9   :  { %54 = shalt.err (!%p51_p4)
}
   0xa   :  { %s57_s13 = smov [#allocation2]  }
   0xb   :  { %17 = dma.vmem_to_smem %s15_s11, 16, %s57_s13, [#allocation3]  }
   0xc   :  { %55 = dma.done.wait [#allocation3], 16  }
   0xd   :  { %56 = vsyncadd [#allocation3], 4294967280 }
   0xe   :  { %23 = sfence }
   0xf   :  { %s26_s14 = sld [smem:[#allocation2]]  ;;  %v24_v0 = vld [vmem:[%s89_s1] sm:$0xff]  ;;  %v25_v1 = vld [vmem:[%s89_s1 + $0x8] sm:$0xff] }
  0x10   :  { %s41_s15 = sld [smem:[#allocation2 + $0x1]] }
  0x15   :  { %v28_v2 = vstv %s26_s14 }
  0x16   :  { %vm29_vm0 = vcmp.gt.f32.partialorder %v24_v0, %v28_v2  ;;  %v31_v3 = vstv %s41_s15  ;;  %vm30_vm1 = vcmp.gt.f32.partialorder %v25_v1, %v28_v2 }
  0x17   :  { %v32_v4 = vsel %vm29_vm0, %v24_v0, %v31_v3  ;;  %v33_v5 = vsel %vm30_vm1, %v25_v1, %v31_v3 }
  0x18   :  { %34 = vst [vmem:[%s90_s2] sm:$0xff] %v32_v4  ;;  %35 = vst [vmem:[%s90_s2 + $0x8] sm:$0xff] %v33_v5 }
  0x19   :  { %40 = vsyncpa [#allocation3], 1 }

</bundles_post_ra>
